<compile_context>
chip_gen: v5e
topology: v5e:2x2
jax: 0.10.0
libtpu: 0.0.40
codegen_flags: <defaults>
</compile_context>

<pallas_src>
import jax
import jax.numpy as jnp
from jax.experimental import pallas as pl
from jax.experimental.pallas import tpu as pltpu

_LANES = 128
_SUBLANES = 8


def _round_up(x, m):
    return ((x + m - 1) // m) * m


def _default_num_shards():
    # v7x has 2 TensorCores per chip; on v5e/v6e a second shard is a purely
    # serial outer loop (extra init/finalize/padding), so keep it at 1 there.
    try:
        kind = jax.devices()[0].device_kind.lower()
        if "v7" in kind:
            return 2
    except Exception:
        pass
    return 1


def _pos_kernel(x_ref, w_ref, num_ref, den_ref):
    """Accumulate sum(w * softplus(-x)) and sum(w) into (1, 8, 128) outputs."""
    b = pl.program_id(1)  # reduction axis (last)

    @pl.when(b == 0)
    def _init():
        num_ref[...] = jnp.zeros_like(num_ref)
        den_ref[...] = jnp.zeros_like(den_ref)

    x = x_ref[...].astype(jnp.float32)           # (block_rows, 128)
    w = w_ref[...].astype(jnp.float32)
    # label == 1  ->  per-element loss = softplus(-x)
    l = jnp.maximum(-x, 0.0) + jnp.log1p(jnp.exp(-jnp.abs(x)))
    # Partial reduction over the major axis only (pure VPU adds); accumulator
    # is one (8,128) vreg resident in the output block across the b axis.
    num_ref[...] += jnp.sum((w * l).reshape(-1, _SUBLANES, _LANES), axis=0)[None]
    den_ref[...] += jnp.sum(w.reshape(-1, _SUBLANES, _LANES), axis=0)[None]


def _neg_kernel(x_ref, num_ref):
    """Accumulate sum(softplus(x)) into a (1, 8, 128) output."""
    b = pl.program_id(1)

    @pl.when(b == 0)
    def _init():
        num_ref[...] = jnp.zeros_like(num_ref)

    x = x_ref[...].astype(jnp.float32)
    # label == 0  ->  per-element loss = softplus(x)
    l = jnp.maximum(x, 0.0) + jnp.log1p(jnp.exp(-jnp.abs(x)))
    num_ref[...] += jnp.sum(l.reshape(-1, _SUBLANES, _LANES), axis=0)[None]


def _slab(x, padded_rows, pad_value):
    """Pad a 1-D stream and reshape lane-dense to (padded_rows, 128)."""
    pad = padded_rows * _LANES - x.shape[0]
    return jnp.pad(x, (0, pad), constant_values=pad_value).reshape(padded_rows, _LANES)


def _tiling(n, max_block_rows, num_shards):
    rows = -(-n // _LANES)
    br = min(max_block_rows,
             _round_up(max(-(-rows // num_shards), 1), _SUBLANES))
    blocks = max(-(-rows // (num_shards * br)), 1)
    padded_rows = num_shards * blocks * br
    return br, blocks, padded_rows


def _pos_sums(pos, w_pos, *, max_block_rows, num_shards):
    n = pos.shape[0]
    if n == 0:
        return jnp.float32(0.0), jnp.float32(0.0)
    br, blocks, padded_rows = _tiling(n, max_block_rows, num_shards)
    z = _slab(pos, padded_rows, 0)       # pad x with 0 (masked by w = 0)
    w = _slab(w_pos, padded_rows, 0)     # pad w with 0 -> contributes nothing
    in_map = lambda c, b: (c * blocks + b, 0)
    out_map = lambda c, b: (c, 0, 0)
    num, den = pl.pallas_call(
        _pos_kernel,
        out_shape=(jax.ShapeDtypeStruct((num_shards, _SUBLANES, _LANES), jnp.float32),
                   jax.ShapeDtypeStruct((num_shards, _SUBLANES, _LANES), jnp.float32)),
        grid_spec=pltpu.PrefetchScalarGridSpec(
            num_scalar_prefetch=0,
            grid=(num_shards, blocks),
            in_specs=[pl.BlockSpec((br, _LANES), in_map),
                      pl.BlockSpec((br, _LANES), in_map)],
            out_specs=(pl.BlockSpec((1, _SUBLANES, _LANES), out_map),
                       pl.BlockSpec((1, _SUBLANES, _LANES), out_map)),
        ),
        compiler_params=pltpu.CompilerParams(
            dimension_semantics=("parallel", "arbitrary")),
    )(z, w)
    return jnp.sum(num), jnp.sum(den)


def _neg_sum(neg, *, max_block_rows, num_shards):
    n = neg.shape[0]
    if n == 0:
        return jnp.float32(0.0)
    br, blocks, padded_rows = _tiling(n, max_block_rows, num_shards)
    # softplus(-30000) == 0 exactly in f32, so padding contributes nothing.
    z = _slab(neg, padded_rows, -30000.0)
    in_map = lambda c, b: (c * blocks + b, 0)
    out_map = lambda c, b: (c, 0, 0)
    num = pl.pallas_call(
        _neg_kernel,
        out_shape=jax.ShapeDtypeStruct((num_shards, _SUBLANES, _LANES), jnp.float32),
        grid_spec=pltpu.PrefetchScalarGridSpec(
            num_scalar_prefetch=0,
            grid=(num_shards, blocks),
            in_specs=[pl.BlockSpec((br, _LANES), in_map)],
            out_specs=pl.BlockSpec((1, _SUBLANES, _LANES), out_map),
        ),
        compiler_params=pltpu.CompilerParams(
            dimension_semantics=("parallel", "arbitrary")),
    )(z)
    return jnp.sum(num)


def weighted_bce_loss(pos_score, neg_score, edge_weight, *,
                      max_block_rows=2048, num_shards=None):
    """Pallas implementation of WeightedBCELoss.forward. Returns a scalar."""
    if num_shards is None:
        num_shards = _default_num_shards()

    pos = pos_score.reshape(-1)
    neg = neg_score.reshape(-1)
    w_pos = edge_weight.reshape(-1)
    n_pos, n_neg = pos.shape[0], neg.shape[0]

    num_pos, den_pos = _pos_sums(pos, w_pos,
                                 max_block_rows=max_block_rows,
                                 num_shards=num_shards)
    num_neg = _neg_sum(neg, max_block_rows=max_block_rows,
                       num_shards=num_shards)

    # avg_w == edge_weight.mean(); nan if n_pos == 0 (matches torch).
    avg_w = den_pos / n_pos
    num = num_pos + avg_w * num_neg
    den = den_pos + avg_w * n_neg
    # NOTE: den == 0 (all-zero edge_weight) yields nan, matching torch.
    return num / den


def _reference(pos_score, neg_score, edge_weight):
    """Pure-JAX reference mirroring the torch module, for validation."""
    scores = jnp.concatenate([pos_score, neg_score]).astype(jnp.float32)
    labels = jnp.concatenate([jnp.ones_like(pos_score),
                              jnp.zeros_like(neg_score)]).astype(jnp.float32)
    avg_w = edge_weight.astype(jnp.float32).mean()
    weights = jnp.concatenate([edge_weight.astype(jnp.float32),
                               avg_w * jnp.ones_like(neg_score, dtype=jnp.float32)])
    per = (jnp.maximum(scores, 0.0) - scores * labels
           + jnp.log1p(jnp.exp(-jnp.abs(scores))))
    return jnp.sum(weights * per) / jnp.sum(weights)


if __name__ == "__main__":
    key = jax.random.PRNGKey(0)
    k1, k2, k3 = jax.random.split(key, 3)

    # Small case (single block per shard, device-aware default shards).
    n_pos, n_neg = 16, 24
    pos_score = jax.random.normal(k1, (n_pos,), dtype=jnp.float32)
    neg_score = jax.random.normal(k2, (n_neg,), dtype=jnp.float32)
    edge_weight = jax.random.uniform(k3, (n_pos,), dtype=jnp.float32)  # in [0, 1)

    loss = jax.block_until_ready(weighted_bce_loss(pos_score, neg_score, edge_weight))
    ref = jax.block_until_ready(_reference(pos_score, neg_score, edge_weight))
    assert jnp.allclose(loss, ref, rtol=1e-5, atol=1e-6), (loss, ref)

    # Larger case with a tiny block size and 2 shards forced, to exercise
    # multi-block accumulation + multi-shard combine on any generation.
    k4, k5, k6 = jax.random.split(key, 3)
    n_pos2, n_neg2 = 3000, 5200
    pos2 = jax.random.normal(k4, (n_pos2,), dtype=jnp.float32)
    neg2 = jax.random.normal(k5, (n_neg2,), dtype=jnp.float32)
    w2 = jax.random.uniform(k6, (n_pos2,), dtype=jnp.float32)

    loss2 = jax.block_until_ready(
        weighted_bce_loss(pos2, neg2, w2, max_block_rows=8, num_shards=2))
    ref2 = jax.block_until_ready(_reference(pos2, neg2, w2))
    assert jnp.allclose(loss2, ref2, rtol=1e-5, atol=1e-6), (loss2, ref2)

    print("KERNEL_OK")
</pallas_src>

<mosaic_0001>
module attributes {stable_mosaic.version = 11 : i64} {
  func.func @_pos_kernel(%arg0: i32, %arg1: i32, %arg2: memref<8x128xf32, #tpu.memory_space<vmem>>, %arg3: memref<8x128xf32, #tpu.memory_space<vmem>>, %arg4: memref<1x8x128xf32, #tpu.memory_space<vmem>>, %arg5: memref<1x8x128xf32, #tpu.memory_space<vmem>>) attributes {dimension_semantics = [#tpu.dimension_semantics<parallel>, #tpu.dimension_semantics<arbitrary>], iteration_bounds = array<i64: 1, 1>, scalar_prefetch = 0 : i64, scratch_operands = 0 : i64, tpu.core_type = #tpu.core_type<tc>, window_params = [{transform_indices = @transform_0, window_bounds = array<i64: 8, 128>}, {transform_indices = @transform_1, window_bounds = array<i64: 8, 128>}, {transform_indices = @transform_2, window_bounds = array<i64: 1, 8, 128>}, {transform_indices = @transform_3, window_bounds = array<i64: 1, 8, 128>}]} {
    %c0_i32 = arith.constant 0 : i32
    %0 = arith.cmpi eq, %arg1, %c0_i32 : i32
    %1 = arith.extui %0 : i1 to i32
    %c0_i32_0 = arith.constant 0 : i32
    %2 = arith.cmpi ne, %1, %c0_i32_0 : i32
    scf.if %2 {
      %cst_20 = arith.constant 0.000000e+00 : f32
      %28 = vector.broadcast %cst_20 : f32 to vector<1x8x128xf32>
      %c0_21 = arith.constant 0 : index
      %c0_22 = arith.constant 0 : index
      %c0_23 = arith.constant 0 : index
      %29 = vector.load %arg4[%c0_21, %c0_22, %c0_23] : memref<1x8x128xf32, #tpu.memory_space<vmem>>, vector<1x8x128xf32>
      tpu.vector_store %arg4[%c0_21, %c0_22, %c0_23], %28 {strides = array<i32>} : memref<1x8x128xf32, #tpu.memory_space<vmem>>, vector<1x8x128xf32>,
      %cst_24 = arith.constant 0.000000e+00 : f32
      %30 = vector.broadcast %cst_24 : f32 to vector<1x8x128xf32>
      %c0_25 = arith.constant 0 : index
      %c0_26 = arith.constant 0 : index
      %c0_27 = arith.constant 0 : index
      %31 = vector.load %arg5[%c0_25, %c0_26, %c0_27] : memref<1x8x128xf32, #tpu.memory_space<vmem>>, vector<1x8x128xf32>
      tpu.vector_store %arg5[%c0_25, %c0_26, %c0_27], %30 {strides = array<i32>} : memref<1x8x128xf32, #tpu.memory_space<vmem>>, vector<1x8x128xf32>,
    } else {
    }
    %c0 = arith.constant 0 : index
    %c0_1 = arith.constant 0 : index
    %3 = vector.load %arg2[%c0, %c0_1] : memref<8x128xf32, #tpu.memory_space<vmem>>, vector<8x128xf32>
    %c0_2 = arith.constant 0 : index
    %c0_3 = arith.constant 0 : index
    %4 = vector.load %arg3[%c0_2, %c0_3] : memref<8x128xf32, #tpu.memory_space<vmem>>, vector<8x128xf32>
    %cst = arith.constant 0.000000e+00 : f32
    %5 = vector.broadcast %cst : f32 to vector<8x128xf32>
    %6 = arith.subf %5, %3 : vector<8x128xf32>
    %cst_4 = arith.constant 0.000000e+00 : f32
    %7 = vector.broadcast %cst_4 : f32 to vector<8x128xf32>
    %8 = arith.maximumf %6, %7 : vector<8x128xf32>
    %9 = math.absf %3 : vector<8x128xf32>
    %cst_5 = arith.constant 0.000000e+00 : f32
    %10 = vector.broadcast %cst_5 : f32 to vector<8x128xf32>
    %11 = arith.subf %10, %9 : vector<8x128xf32>
    %12 = math.exp %11 : vector<8x128xf32>
    %13 = math.log1p %12 : vector<8x128xf32>
    %14 = arith.addf %8, %13 : vector<8x128xf32>
    %c0_6 = arith.constant 0 : index
    %c0_7 = arith.constant 0 : index
    %c0_8 = arith.constant 0 : index
    %15 = vector.load %arg4[%c0_6, %c0_7, %c0_8] : memref<1x8x128xf32, #tpu.memory_space<vmem>>, vector<1x8x128xf32>
    %16 = arith.mulf %4, %14 : vector<8x128xf32>
    %17 = vector.shape_cast %16 : vector<8x128xf32> to vector<1x8x128xf32>
    %cst_9 = arith.constant dense<0.000000e+00> : vector<8x128xf32>
    %18 = vector.multi_reduction <add>, %17, %cst_9 [0] : vector<1x8x128xf32> to vector<8x128xf32>
    %19 = vector.shape_cast %18 : vector<8x128xf32> to vector<1x8x128xf32>
    %20 = arith.addf %15, %19 : vector<1x8x128xf32>
    %c0_10 = arith.constant 0 : index
    %c0_11 = arith.constant 0 : index
    %c0_12 = arith.constant 0 : index
    %21 = vector.load %arg4[%c0_10, %c0_11, %c0_12] : memref<1x8x128xf32, #tpu.memory_space<vmem>>, vector<1x8x128xf32>
    tpu.vector_store %arg4[%c0_10, %c0_11, %c0_12], %20 {strides = array<i32>} : memref<1x8x128xf32, #tpu.memory_space<vmem>>, vector<1x8x128xf32>,
    %c0_13 = arith.constant 0 : index
    %c0_14 = arith.constant 0 : index
    %c0_15 = arith.constant 0 : index
    %22 = vector.load %arg5[%c0_13, %c0_14, %c0_15] : memref<1x8x128xf32, #tpu.memory_space<vmem>>, vector<1x8x128xf32>
    %23 = vector.shape_cast %4 : vector<8x128xf32> to vector<1x8x128xf32>
    %cst_16 = arith.constant dense<0.000000e+00> : vector<8x128xf32>
    %24 = vector.multi_reduction <add>, %23, %cst_16 [0] : vector<1x8x128xf32> to vector<8x128xf32>
    %25 = vector.shape_cast %24 : vector<8x128xf32> to vector<1x8x128xf32>
    %26 = arith.addf %22, %25 : vector<1x8x128xf32>
    %c0_17 = arith.constant 0 : index
    %c0_18 = arith.constant 0 : index
    %c0_19 = arith.constant 0 : index
    %27 = vector.load %arg5[%c0_17, %c0_18, %c0_19] : memref<1x8x128xf32, #tpu.memory_space<vmem>>, vector<1x8x128xf32>
    tpu.vector_store %arg5[%c0_17, %c0_18, %c0_19], %26 {strides = array<i32>} : memref<1x8x128xf32, #tpu.memory_space<vmem>>, vector<1x8x128xf32>,
    return
  }
  func.func @transform_0(%arg0: i32, %arg1: i32) -> (i32, i32) {
    %c1_i32 = arith.constant 1 : i32
    %0 = arith.muli %arg0, %c1_i32 : i32
    %1 = arith.addi %0, %arg1 : i32
    %c0_i32 = arith.constant 0 : i32
    %c0_i32_0 = arith.constant 0 : i32
    return %1, %c0_i32 : i32, i32
  }
  func.func @transform_1(%arg0: i32, %arg1: i32) -> (i32, i32) {
    %c1_i32 = arith.constant 1 : i32
    %0 = arith.muli %arg0, %c1_i32 : i32
    %1 = arith.addi %0, %arg1 : i32
    %c0_i32 = arith.constant 0 : i32
    %c0_i32_0 = arith.constant 0 : i32
    return %1, %c0_i32 : i32, i32
  }
  func.func @transform_2(%arg0: i32, %arg1: i32) -> (i32, i32, i32) {
    %c0_i32 = arith.constant 0 : i32
    %c0_i32_0 = arith.constant 0 : i32
    %c0_i32_1 = arith.constant 0 : i32
    return %arg0, %c0_i32, %c0_i32_0 : i32, i32, i32
  }
  func.func @transform_3(%arg0: i32, %arg1: i32) -> (i32, i32, i32) {
    %c0_i32 = arith.constant 0 : i32
    %c0_i32_0 = arith.constant 0 : i32
    %c0_i32_1 = arith.constant 0 : i32
    return %arg0, %c0_i32, %c0_i32_0 : i32, i32, i32
  }
}

</mosaic_0001>

<bundles_post_ra>
// kernel: tpu_custom_call.1
= control target key start
LH: loop header
LB: loop body
LE: loop exit
PB: predicated region body
PF: predicated region fallthrough
CT: control target
= control target key end

     0   :  { %9 = vsyncpa [#allocation3], 0  ;;  %s267_s0 = inlined_call_operand.hbm [shape: f32[8,128], index: 0, kind: input, shape index: {}]   ;;  %s268_s1 = inlined_call_operand.hbm [shape: f32[8,128], index: 1, kind: input, shape index: {}]   ;;  %s269_s2 = inlined_call_operand.hbm [shape: f32[1,8,128], index: 2, kind: output, shape index: {0}]   ;;  %s270_s3 = inlined_call_operand.hbm [shape: f32[1,8,128], index: 3, kind: output, shape index: {1}]  }
   0x1   :  { %10 = vsyncpa [#allocation6], 0 }
   0x2   :  { %11 = vsyncpa [#allocation4], 0 }
   0x3   :  { %12 = vsyncpa [#allocation9], 0  ;;  %s21_s14 = sshll.u32 %s267_s0, 4  ;;  %s231_s15 = smov [#allocation2]   ;;  %s22_s14 = int_to_ptr.hbm [resolvable:$true] %s21_s14 }
   0x4   :  { %s23_s16 = sshll.u32 %s231_s15, 4  ;;  %s35_s19 = sshll.u32 %s268_s1, 4  ;;  %s24_s16 = int_to_ptr.vmem [resolvable:$true] %s23_s16  ;;  %s36_s19 = int_to_ptr.hbm [resolvable:$true] %s35_s19 }
   0x5   :  { %26 = dma.hbm_to_vmem [thread:$0]  %s22_s14, 128, %s24_s16, [#allocation3]  }
   0x6   :  { %s232_s20 = smov [#allocation5]  }
   0x7   :  { %s37_s21 = sshll.u32 %s232_s20, 4  ;;  %s38_s21 = int_to_ptr.vmem [resolvable:$true] %s37_s21 }
   0x8   :  { %40 = dma.hbm_to_vmem [thread:$0]  %s36_s19, 128, %s38_s21, [#allocation6]  }
   0x9   :  { %223 = dma.done.wait [#allocation3], 128  }
   0xa   :  { %224 = vsyncadd [#allocation3], 4294967168 }
   0xb   :  { %225 = dma.done.wait [#allocation6], 128  }
   0xc   :  { %226 = vsyncadd [#allocation6], 4294967168  ;;  %s233_s22 = smov [#allocation8]   ;;  %s102_s25 = sshll.u32 %s270_s3, 4  ;;  %v57_v0 = vld [vmem:[#allocation2] sm:$0xff]  ;;  %v58_v1 = vld [vmem:[#allocation5] sm:$0xff]  ;;  %s103_s25 = int_to_ptr.hbm [resolvable:$true] %s102_s25 }
   0xd   :  { %s100_s0 = sshll.u32 %s233_s22, 4  ;;  %v61_v2 = vand.u32 2147483647, %v57_v0  ;;  %83 = vst [vmem:[#allocation8] sm:$0xff] %v58_v1  ;;  %v59_v9 = vsub.f32 0.0, %v57_v0  ;;  %s234_s1 = smov [#allocation7]   ;;  %s101_s0 = int_to_ptr.vmem [resolvable:$true] %s100_s0 }
   0xe   :  { %105 = dma.vmem_to_hbm [thread:$0]  %s101_s0, 128, %s103_s25, [#allocation9]  }
   0xf   :  { %v62_v3 = vsub.f32 0.0, %v61_v2  ;;  %v60_v13 = vmax.f32 %v59_v9, 0.0  ;;  %s89_s3 = sshll.u32 %s234_s1, 4  ;;  %s91_s28 = sshll.u32 %s269_s2, 4  ;;  %s90_s3 = int_to_ptr.vmem [resolvable:$true] %s89_s3  ;;  %s92_s28 = int_to_ptr.hbm [resolvable:$true] %s91_s28 }
  0x11   :  { %v63_v4 = vmul.f32 1.442695, %v62_v3 }
  0x13   :  { %123 = vpow2.f32 %v63_v4 }
  0x19   :  { %v124_v5 = vpop.eup %123 }
  0x1a   :  { %v65_v6 = vadd.f32 1.0, %v124_v5  ;;  %v68_v7 = vmul.f32 -0.5, %v124_v5  ;;  %v71_v10 = vand.u32 2147483647, %v124_v5 }
  0x1c   :  { %125 = vlog2.f32 %v65_v6  ;;  %v69_v8 = vadd.f32 1.0, %v68_v7  ;;  %vm72_vm0 = vcmp.lt.f32.partialorder %v71_v10, 0.0004427343 }
  0x1e   :  { %v70_v11 = vmul.f32 %v124_v5, %v69_v8 }
  0x22   :  { %v126_v12 = vpop.eup %125 }
  0x23   :  { %v67_v14 = vmul.f32 0.6931472, %v126_v12 }
  0x25   :  { %v73_v15 = vsel %vm72_vm0, %v70_v11, %v67_v14 }
  0x26   :  { %v74_v16 = vadd.f32 %v73_v15, %v60_v13 }
  0x28   :  { %v76_v17 = vmul.f32 %v74_v16, %v58_v1 }
  0x2a   :  { %79 = vst [vmem:[#allocation7] sm:$0xff] %v76_v17 }
  0x2b   :  { %94 = dma.vmem_to_hbm [thread:$0]  %s90_s3, 128, %s92_s28, [#allocation4]  }
  0x2c   :  { %227 = dma.done.wait [#allocation4], 128  }
  0x2d   :  { %228 = vsyncadd [#allocation4], 4294967168 }
  0x2e   :  { %229 = dma.done.wait [#allocation9], 128  }
  0x2f   :  { %230 = vsyncadd [#allocation9], 4294967168 }
  0x30   :  { %114 = vsyncpa [#allocation3], 1 }
  0x31   :  { %115 = vsyncpa [#allocation6], 1 }
  0x32   :  { %116 = vsyncpa [#allocation4], 1 }
  0x33   :  { %117 = vsyncpa [#allocation9], 1 }

</bundles_post_ra>
